<compile_context>
chip_gen: v5e
topology: v5e:2x2
jax: 0.10.0
libtpu: 0.0.40
codegen_flags: <defaults>
</compile_context>

<pallas_src>
import functools

import jax
import jax.numpy as jnp
from jax.experimental import pallas as pl
from jax.experimental.pallas import tpu as pltpu


def _round_up(x, m):
    return ((x + m - 1) // m) * m


def _correct_count_kernel(logits_ref, target_ref, partial_ref, *, n_rows, need_row_mask):
    """Per-tile count of rows where argmax(logits, axis=1) == target.

    logits_ref:  (TILE_N, C) native dtype (f32/bf16), classes on lanes.
    target_ref:  (TILE_N, 1) int32.
    partial_ref: (8, 128) int32 -- this tile's count at [0, 0], zeros elsewhere.
    """
    x = logits_ref[...]
    tn, c = x.shape

    # torch.argmax(dim=1) semantics: FIRST index attaining the row max.
    col = jax.lax.broadcasted_iota(jnp.int32, (tn, c), 1)
    row_max = jnp.max(x, axis=1, keepdims=True)                      # (TILE_N, 1)
    arg = jnp.min(jnp.where(x == row_max, col, jnp.int32(c)),
                  axis=1, keepdims=True)                             # (TILE_N, 1)
    # NOTE: a row whose max path is NaN yields sentinel index C (never counted);
    # differs from torch's NaN handling but is the sane choice for a metric.

    hit = arg == target_ref[...]                                     # (TILE_N, 1)
    if need_row_mask:
        # Last grid tile may read padded/garbage rows past the true N.
        i = pl.program_id(0)
        row_ids = i * tn + jax.lax.broadcasted_iota(jnp.int32, (tn, 1), 0)
        hit = hit & (row_ids < n_rows)
    count = jnp.sum(jnp.where(hit, jnp.int32(1), jnp.int32(0)))      # scalar

    # Lane-dense, (8,128)-aligned output block; count lives only at [0, 0].
    r = jax.lax.broadcasted_iota(jnp.int32, (8, 128), 0)
    l = jax.lax.broadcasted_iota(jnp.int32, (8, 128), 1)
    partial_ref[...] = jnp.where((r == 0) & (l == 0), count, jnp.int32(0))


def _pick_tile_n(n, c, itemsize, budget_bytes=8 * 1024 * 1024):
    """Rows per tile: keep one double-buffered logits tile well inside VMEM
    on every generation (v7x scoped VMEM is the tightest at 32 MiB)."""
    t = budget_bytes // max(1, c * itemsize)
    t = max(8, (t // 8) * 8)          # sublane-aligned
    t = min(t, 1024)                  # diminishing returns past ~1K rows
    t = min(t, _round_up(n, 8))       # never bigger than (padded) N
    return max(t, 8)


def correct_rate(out, target, *, tile_n=None):
    """out: (N, C) float logits, target: (N,) integer labels -> scalar int32."""
    n, c = out.shape
    itemsize = jnp.dtype(out.dtype).itemsize
    if tile_n is None:
        tile_n = _pick_tile_n(n, c, itemsize)
    else:
        tile_n = max(8, _round_up(int(tile_n), 8))
    num_tiles = pl.cdiv(n, tile_n)
    need_row_mask = (n % tile_n) != 0

    tgt2 = target.reshape(n, 1).astype(jnp.int32)

    cost = pl.CostEstimate(
        flops=n * c,
        transcendentals=0,
        bytes_accessed=n * c * itemsize + n * 4 + num_tiles * 8 * 128 * 4,
    )

    partials = pl.pallas_call(
        functools.partial(_correct_count_kernel, n_rows=n,
                          need_row_mask=need_row_mask),
        out_shape=jax.ShapeDtypeStruct((num_tiles * 8, 128), jnp.int32),
        grid=(num_tiles,),
        in_specs=[
            pl.BlockSpec((tile_n, c), lambda i: (i, 0)),   # logits row tile
            pl.BlockSpec((tile_n, 1), lambda i: (i, 0)),   # target row tile
        ],
        out_specs=pl.BlockSpec((8, 128), lambda i: (i, 0)),
        compiler_params=pltpu.CompilerParams(
            dimension_semantics=("parallel",),             # v7x: 2 TCs share tiles
            vmem_limit_bytes=32 * 1024 * 1024,
        ),
        cost_estimate=cost,
    )(out, tgt2)
    # TODO(synk): for very large C (100K+ vocab) also tile the class axis with a
    # running row-max / first-argmax carried across C-tiles.
    return jnp.sum(partials[:, 0])


if __name__ == "__main__":
    key = jax.random.PRNGKey(0)
    k1, k2, k3, k4 = jax.random.split(key, 4)

    # Case 1: small shape matching the module's toy usage (f32, single tile,
    # N divisible by the tile -> row mask elided at trace time).
    N1, C1 = 8, 32
    logits1 = jax.random.normal(k1, (N1, C1), dtype=jnp.float32)
    target1 = jax.random.randint(k2, (N1,), 0, C1, dtype=jnp.int32)
    res1 = correct_rate(logits1, target1)
    jax.block_until_ready(res1)
    ref1 = jnp.sum(jnp.argmax(logits1, axis=1).astype(jnp.int32) == target1)
    assert int(res1) == int(ref1), (int(res1), int(ref1))

    # Case 2: native bf16 logits, N not a multiple of the tile, multi-tile grid
    # (exercises the pipelined path and the last-tile row mask).
    N2, C2 = 300, 256
    logits2 = jax.random.normal(k3, (N2, C2), dtype=jnp.bfloat16)
    target2 = jax.random.randint(k4, (N2,), 0, C2, dtype=jnp.int32)
    res2 = correct_rate(logits2, target2, tile_n=64)
    jax.block_until_ready(res2)
    ref2 = jnp.sum(jnp.argmax(logits2, axis=1).astype(jnp.int32) == target2)
    assert int(res2) == int(ref2), (int(res2), int(ref2))

    print("KERNEL_OK")
</pallas_src>

<mosaic_0001>
module attributes {stable_mosaic.version = 11 : i64} {
  func.func @_correct_count_kernel(%arg0: i32, %arg1: memref<8x32xf32, #tpu.memory_space<vmem>>, %arg2: memref<8x1xi32, #tpu.memory_space<vmem>>, %arg3: memref<8x128xi32, #tpu.memory_space<vmem>>) attributes {dimension_semantics = [#tpu.dimension_semantics<parallel>], iteration_bounds = array<i64: 1>, scalar_prefetch = 0 : i64, scratch_operands = 0 : i64, tpu.core_type = #tpu.core_type<tc>, window_params = [{transform_indices = @transform_0, window_bounds = array<i64: 8, 32>}, {transform_indices = @transform_1, window_bounds = array<i64: 8, 1>}, {transform_indices = @transform_2, window_bounds = array<i64: 8, 128>}]} {
    %c0 = arith.constant 0 : index
    %c0_0 = arith.constant 0 : index
    %0 = vector.load %arg1[%c0, %c0_0] : memref<8x32xf32, #tpu.memory_space<vmem>>, vector<8x32xf32>
    %1 = tpu.iota {dimensions = array<i32: 1>} : vector<8x32xi32>
    %cst = arith.constant dense<0xFF800000> : vector<8xf32>
    %2 = vector.multi_reduction <maximumf>, %0, %cst [1] : vector<8x32xf32> to vector<8xf32>
    %3 = vector.shape_cast %2 : vector<8xf32> to vector<8x1xf32>
    %4 = vector.broadcast %3 : vector<8x1xf32> to vector<8x32xf32>
    %5 = arith.cmpf oeq, %0, %4 : vector<8x32xf32>
    %c32_i32 = arith.constant 32 : i32
    %6 = vector.broadcast %c32_i32 : i32 to vector<8x32xi32>
    %7 = arith.select %5, %1, %6 : vector<8x32xi1>, vector<8x32xi32>
    %cst_1 = arith.constant dense<2147483647> : vector<8xi32>
    %8 = vector.multi_reduction <minsi>, %7, %cst_1 [1] : vector<8x32xi32> to vector<8xi32>
    %9 = vector.shape_cast %8 : vector<8xi32> to vector<8x1xi32>
    %c0_2 = arith.constant 0 : index
    %c0_3 = arith.constant 0 : index
    %10 = vector.load %arg2[%c0_2, %c0_3] : memref<8x1xi32, #tpu.memory_space<vmem>>, vector<8x1xi32>
    %11 = arith.cmpi eq, %9, %10 : vector<8x1xi32>
    %c1_i32 = arith.constant 1 : i32
    %c0_i32 = arith.constant 0 : i32
    %12 = vector.broadcast %c1_i32 : i32 to vector<8x1xi32>
    %13 = vector.broadcast %c0_i32 : i32 to vector<8x1xi32>
    %14 = arith.select %11, %12, %13 : vector<8x1xi1>, vector<8x1xi32>
    %15 = vector.shape_cast %14 : vector<8x1xi32> to vector<1x8x1xi32>
    %cst_4 = arith.constant dense<0> : vector<1xi32>
    %16 = vector.multi_reduction <add>, %15, %cst_4 [1, 2] : vector<1x8x1xi32> to vector<1xi32>
    %17 = vector.shape_cast %16 : vector<1xi32> to vector<1x1x1xi32>
    %18 = vector.extract %17[0, 0, 0] : i32 from vector<1x1x1xi32>
    %19 = tpu.iota {dimensions = array<i32: 0>} : vector<8x128xi32>
    %20 = tpu.iota {dimensions = array<i32: 1>} : vector<8x128xi32>
    %c0_i32_5 = arith.constant 0 : i32
    %21 = vector.broadcast %c0_i32_5 : i32 to vector<8x128xi32>
    %22 = arith.cmpi eq, %19, %21 : vector<8x128xi32>
    %c0_i32_6 = arith.constant 0 : i32
    %23 = vector.broadcast %c0_i32_6 : i32 to vector<8x128xi32>
    %24 = arith.cmpi eq, %20, %23 : vector<8x128xi32>
    %25 = arith.andi %22, %24 : vector<8x128xi1>
    %c0_i32_7 = arith.constant 0 : i32
    %26 = vector.broadcast %18 : i32 to vector<8x128xi32>
    %27 = vector.broadcast %c0_i32_7 : i32 to vector<8x128xi32>
    %28 = arith.select %25, %26, %27 : vector<8x128xi1>, vector<8x128xi32>
    %c0_8 = arith.constant 0 : index
    %c0_9 = arith.constant 0 : index
    %29 = vector.load %arg3[%c0_8, %c0_9] : memref<8x128xi32, #tpu.memory_space<vmem>>, vector<8x128xi32>
    tpu.vector_store %arg3[%c0_8, %c0_9], %28 {strides = array<i32>} : memref<8x128xi32, #tpu.memory_space<vmem>>, vector<8x128xi32>,
    return
  }
  func.func @transform_0(%arg0: i32) -> (i32, i32) {
    %c0_i32 = arith.constant 0 : i32
    %c0_i32_0 = arith.constant 0 : i32
    return %arg0, %c0_i32 : i32, i32
  }
  func.func @transform_1(%arg0: i32) -> (i32, i32) {
    %c0_i32 = arith.constant 0 : i32
    %c0_i32_0 = arith.constant 0 : i32
    return %arg0, %c0_i32 : i32, i32
  }
  func.func @transform_2(%arg0: i32) -> (i32, i32) {
    %c0_i32 = arith.constant 0 : i32
    %c0_i32_0 = arith.constant 0 : i32
    return %arg0, %c0_i32 : i32, i32
  }
}

</mosaic_0001>

<bundles_post_ra>
// kernel: tpu_custom_call.1
= control target key start
LH: loop header
LB: loop body
LE: loop exit
PB: predicated region body
PF: predicated region fallthrough
CT: control target
= control target key end

     0   :  { %vm15_vm0 = vcmask 261120   ;;  %s140_s0 = inlined_call_operand.vmem [shape: f32[8,32], index: 0, kind: input, shape index: {}]   ;;  %s141_s1 = inlined_call_operand.vmem [shape: s32[8,1], index: 1, kind: input, shape index: {}]   ;;  %s142_s2 = inlined_call_operand.hbm [shape: s32[8,128], index: 2, kind: output, shape index: {}]  }
   0x1   :  { %v12_v0 = vld [vmem:[%s140_s0] sm:$0xff] }
   0x2   :  { %7 = vsyncpa [#allocation3], 0  ;;  %v16_v1 = vsel %vm15_vm0, %v12_v0, -inf  ;;  %v13_v2 = vlaneseq  ;;  %v36_v17 = vld [vmem:[%s141_s1] sm:$0xff]  ;;  %vm39_vm3 = vcmask 7168   ;;  %v114_v19 = vmov 0  }
   0x3   :  { %17 = vmax.xlane.f32.xlu0 %v16_v1  ;;  %s115_s1 = smov [#allocation2]   ;;  %s75_s15 = sshll.u32 %s142_s2, 4  ;;  %s76_s15 = int_to_ptr.hbm [resolvable:$true] %s75_s15 }
   0x4   :  { %v14_v3 = vand.u32 127, %v13_v2  ;;  %v61_v38 = vshrl.u32 %v13_v2, 7  ;;  %s73_s12 = sshll.u32 %s115_s1, 4  ;;  %s74_s12 = int_to_ptr.vmem [resolvable:$true] %s73_s12 }
   0x6   :  { %vm62_vm5 = vcmp.eq.s32.totalorder %v61_v38, 0  ;;  %vm63_vm6 = vcmp.eq.s32.totalorder %v14_v3, 0 }
   0x7   :  { %vm64_vm7 = vmand %vm62_vm5, %vm63_vm6 }
  0x76   :  { %v18_v4 = vpop.xlane.xlu0 %17 }
  0x77   :  { %vm19_vm1 = vcmp.eq.f32.partialorder %v12_v0, %v18_v4 }
  0x78   :  { %v20_v5 = vsel %vm19_vm1, %v14_v3, 32 }
  0x79   :  { %v21_v6 = vsel %vm15_vm0, %v20_v5, 2147483647 }
  0x7a   :  { %v23_v7 = vshra.s32 %v21_v6, 16  ;;  %v22_v9 = vand.u32 65535, %v21_v6 }
  0x7c   :  { %v25_v8 = vcvt.s32.f32 %v23_v7  ;;  %v24_v11 = vcvt.s32.f32 %v22_v9 }
  0x7e   :  { %26 = vmin.xlane.f32.xlu0 %v25_v8 }
  0xf1   :  { %v27_v10 = vpop.xlane.xlu0 %26 }
  0xf2   :  { %vm28_vm2 = vcmp.eq.f32.partialorder %v25_v8, %v27_v10  ;;  %v33_v13 = vcvt.f32.s32 %v27_v10 }
  0xf3   :  { %v29_v12 = vsel %vm28_vm2, %v24_v11, inf }
  0xf4   :  { %30 = vmin.xlane.f32.xlu1 %v29_v12  ;;  %v34_v15 = vshll.u32 %v33_v13, 16 }
 0x167   :  { %v31_v14 = vpop.xlane.xlu1 %30 }
 0x168   :  { %v32_v16 = vcvt.f32.s32 %v31_v14 }
 0x16a   :  { %v35_v18 = vadd.s32 %v34_v15, %v32_v16 }
 0x16c   :  { %vm37_vm4 = vcmp.eq.s32.totalorder %v35_v18, %v36_v17 }
 0x16d   :  { %v38_v20 = vsel %vm37_vm4, 1, %v114_v19 }
 0x16e   :  { %v40_v21 = vsel %vm39_vm3, %v38_v20, 0 }
 0x16f   :  { %v42_v22 = vshrl.u32 %v40_v21, 16  ;;  %v41_v23 = vand.u32 65535, %v40_v21 }
 0x171   :  { %v44_v24 = vcvt.s32.f32 %v42_v22  ;;  %v43_v25 = vcvt.s32.f32 %v41_v23 }
 0x173   :  { %47 = vadd.xlane.f32.xlu1 %v44_v24  ;;  %45 = vadd.xlane.f32.xlu2 %v43_v25 }
 0x1e6   :  { %v48_v26 = vpop.xlane.xlu1 %47  ;;  %v46_v27 = vpop.xlane.xlu2 %45 }
 0x1e7   :  { %v50_v28 = vcvt.f32.s32 %v48_v26  ;;  %v49_v30 = vcvt.f32.s32 %v46_v27 }
 0x1e9   :  { %v51_v29 = vshll.u32 %v50_v28, 16 }
 0x1eb   :  { %v52_v31 = vadd.s32 %v51_v29, %v49_v30 }
 0x1ed   :  { %v53_v32 = vrot.slane %v52_v31, 4 }
 0x1ef   :  { %v54_v33 = vadd.s32 %v53_v32, %v52_v31 }
 0x1f1   :  { %v55_v34 = vrot.slane %v54_v33, 2 }
 0x1f3   :  { %v56_v35 = vadd.s32 %v55_v34, %v54_v33 }
 0x1f5   :  { %v57_v36 = vrot.slane %v56_v35, 1 }
 0x1f7   :  { %v58_v37 = vadd.s32 %v57_v36, %v56_v35 }
 0x1f9   :  { %84 = vpush %v58_v37 }
 0x22a   :  { %s85_s16 = spop %84 }
 0x22b   :  { %v65_v39 = vstv %s85_s16 }
 0x22c   :  { %v66_v40 = vsel %vm64_vm7, %v65_v39, 0 }
 0x22d   :  { %67 = vst [vmem:[#allocation2] sm:$0xff] %v66_v40 }
 0x22e   :  { %78 = dma.vmem_to_hbm [thread:$0]  %s74_s12, 128, %s76_s15, [#allocation3]  }
 0x22f   :  { %112 = dma.done.wait [#allocation3], 128  }
 0x230   :  { %113 = vsyncadd [#allocation3], 4294967168 }
 0x231   :  { %83 = vsyncpa [#allocation3], 1 }

</bundles_post_ra>
